<compile_context>
chip_gen: v7x
topology: tpu7x:2x2x1
jax: 0.10.0
libtpu: 0.0.40
codegen_flags: <defaults>
</compile_context>

<pallas_src>
import functools

import jax
import jax.numpy as jnp
from jax.experimental import pallas as pl
from jax.experimental.pallas import tpu as pltpu


def _round_up(n, m):
    return ((n + m - 1) // m) * m


def glu_kernel(x_ref, w1v_ref, b1v_ref, w1g_ref, b1g_ref, w2_ref, b2_ref,
               gamma_ref, beta_ref, o_ref, *, eps):
    # x tile: (tile_rows, D). Residual add and LayerNorm stay in f32.
    x = x_ref[...].astype(jnp.float32)
    xb = x.astype(w1v_ref.dtype)          # MXU-native operand (bf16 by default)

    # fc1 as two (D, D) dots (value half / gate half); f32 accumulation,
    # bias add in f32. Same FLOPs as a fused (D, 2D) dot, but no lane slice
    # and half the live f32 intermediate.
    gate = jnp.dot(xb, w1g_ref[...], preferred_element_type=jnp.float32) + b1g_ref[...]
    value = jnp.dot(xb, w1v_ref[...], preferred_element_type=jnp.float32) + b1v_ref[...]

    # sigmoid(g) = 1 / (1 + exp(-g)): exp and approx-reciprocal both land in
    # the (otherwise idle) EUP slot instead of VALU divides.
    gated = value * pl.reciprocal(1.0 + jnp.exp(-gate), approx=True)

    # fc2 (bf16 operands, f32 accumulation).
    y = jnp.dot(gated.astype(w2_ref.dtype), w2_ref[...],
                preferred_element_type=jnp.float32) + b2_ref[...]

    # dropout(p=0.2) in eval mode is the identity; residual add.
    z = y + x

    # LayerNorm over the real feature axis (block lane width == D, so no
    # lane mask is needed). Any garbage rows in a ragged last tile stay in
    # their own rows and are dropped by the masked output writeback.
    mu = jnp.mean(z, axis=-1, keepdims=True)
    zc = z - mu
    var = jnp.mean(zc * zc, axis=-1, keepdims=True)
    norm = zc * jax.lax.rsqrt(var + eps)
    o_ref[...] = (norm * gamma_ref[...] + beta_ref[...]).astype(o_ref.dtype)


def pack_glu_params(params, dot_dtype=jnp.bfloat16):
    """One-time weight packing (transpose / split / cast). Do NOT call per step.

    torch Linear: y = x @ W.T + b.  W1: (2D, D); chunk(dim=-1) means
    value = first D output features (rows [:D] of W1), gate = last D.
    Pass dot_dtype=jnp.float32 for exact-precision matmuls.
    """
    D = params["w2"].shape[0]
    f32 = jnp.float32
    w1 = params["w1"]
    return {
        "w1v": jnp.asarray(w1[:D, :].T, dot_dtype),     # (D, D) value half
        "w1g": jnp.asarray(w1[D:, :].T, dot_dtype),     # (D, D) gate half
        "b1v": jnp.asarray(params["b1"][:D], f32).reshape(1, D),
        "b1g": jnp.asarray(params["b1"][D:], f32).reshape(1, D),
        "w2": jnp.asarray(params["w2"].T, dot_dtype),   # (D, D)
        "b2": jnp.asarray(params["b2"], f32).reshape(1, D),
        "gamma": jnp.asarray(params["gamma"], f32).reshape(1, D),
        "beta": jnp.asarray(params["beta"], f32).reshape(1, D),
    }


def glu_forward(x, packed, *, tile_rows=512, eps=1e-12, out_dtype=None):
    """x: (B, S, D). packed: output of pack_glu_params. Returns (B, S, D)."""
    B, S, D = x.shape
    N = B * S
    out_dtype = x.dtype if out_dtype is None else jnp.dtype(out_dtype)

    # Row tile: large (512 default) to amortize the ~0.35us/step pipeline
    # overhead and reuse the pushed MXU RHS, but capped at ceil(N/2) so the
    # row grid always has >= 2 steps and megacore can split work across the
    # two v7x TensorCores. Must be a multiple of 8 (sublane constraint).
    tile = min(_round_up(tile_rows, 8), _round_up(max(pl.cdiv(N, 2), 8), 8))
    grid = (pl.cdiv(N, tile),)          # ragged last block handled by Pallas

    # No feature padding, no row padding: stream the activations as-is.
    x2d = x.reshape(N, D)

    w_itemsize = jnp.dtype(packed["w1v"].dtype).itemsize
    w_bytes = 3 * D * D * w_itemsize            # w1v + w1g + w2, one copy
    # Single-buffer the grid-invariant weights only when double-buffering them
    # would eat a large chunk of VMEM (v7x has 64 MiB total per core).
    weight_buffers = 1 if 2 * w_bytes > (24 << 20) else None

    def _const_spec(shape):
        idx = lambda i: (0,) * len(shape)
        if weight_buffers is None:
            return pl.BlockSpec(shape, idx)
        return pl.BlockSpec(shape, idx,
                            pipeline_mode=pl.Buffered(buffer_count=weight_buffers))

    row_in_spec = pl.BlockSpec((tile, D), lambda i: (i, 0))
    row_out_spec = pl.BlockSpec((tile, D), lambda i: (i, 0))
    w_spec = _const_spec((D, D))
    vec_spec = pl.BlockSpec((1, D), lambda i: (0, 0))   # tiny, default buffering

    # VMEM footprint estimate, now including the in-kernel f32 temporaries
    # (x, gate, value, gated, y, z, zc, norm ~ 8 live tile x D f32 arrays,
    # counted generously) on top of double-buffered I/O tiles and the
    # resident weights.
    wb = 2 if weight_buffers is None else weight_buffers
    est = 2 * tile * D * (x.dtype.itemsize + out_dtype.itemsize)   # in/out tiles
    est += wb * w_bytes                                             # weights
    est += 2 * 6 * D * 4                                            # bias/gamma/beta
    est += 8 * tile * D * 4 + tile * D * w_itemsize                 # kernel temps
    # Raise the scoped limit only when the smallest default (16 MiB on v5e)
    # would not be enough; v6e/v7x defaults are 32 MiB.
    vmem_limit = min(est + (8 << 20), 100 << 20) if est > (16 << 20) else None

    out = pl.pallas_call(
        functools.partial(glu_kernel, eps=eps),
        out_shape=jax.ShapeDtypeStruct((N, D), out_dtype),
        grid=grid,
        in_specs=[row_in_spec,            # x tile
                  w_spec, vec_spec,       # fc1 value-half weight, bias
                  w_spec, vec_spec,       # fc1 gate-half weight, bias
                  w_spec, vec_spec,       # fc2 weight, bias
                  vec_spec, vec_spec],    # layernorm gamma, beta
        out_specs=row_out_spec,
        compiler_params=pltpu.CompilerParams(
            dimension_semantics=("parallel",),
            vmem_limit_bytes=vmem_limit),
    )(x2d, packed["w1v"], packed["b1v"], packed["w1g"], packed["b1g"],
      packed["w2"], packed["b2"], packed["gamma"], packed["beta"])

    return out.reshape(B, S, D)


def init_params(key, d_model):
    ks = jax.random.split(key, 4)
    scale = 0.02
    return {
        "w1": scale * jax.random.normal(ks[0], (2 * d_model, d_model), jnp.float32),
        "b1": scale * jax.random.normal(ks[1], (2 * d_model,), jnp.float32),
        "w2": scale * jax.random.normal(ks[2], (d_model, d_model), jnp.float32),
        "b2": scale * jax.random.normal(ks[3], (d_model,), jnp.float32),
        "gamma": jnp.ones((d_model,), jnp.float32),
        "beta": jnp.zeros((d_model,), jnp.float32),
    }


def glu_reference(x, params, eps=1e-12):
    """Pure-JAX f32 reference matching the PyTorch forward (eval mode)."""
    D = x.shape[-1]
    h = x @ params["w1"].T + params["b1"]
    value, gate = h[..., :D], h[..., D:]
    gated = value * jax.nn.sigmoid(gate)
    y = gated @ params["w2"].T + params["b2"]
    z = y + x
    mu = jnp.mean(z, axis=-1, keepdims=True)
    var = jnp.mean((z - mu) ** 2, axis=-1, keepdims=True)
    return (z - mu) / jnp.sqrt(var + eps) * params["gamma"] + params["beta"]


if __name__ == "__main__":
    key = jax.random.PRNGKey(0)
    k_x, k_p = jax.random.split(key)

    B, S, D = 2, 8, 32
    x = jax.random.normal(k_x, (B, S, D), jnp.float32)
    params = init_params(k_p, D)

    packed = pack_glu_params(params)          # one-time weight packing
    fwd = jax.jit(glu_forward)

    out = jax.block_until_ready(fwd(x, packed))

    ref = glu_reference(x, params)
    assert out.shape == (B, S, D)
    # bf16 matmul operands + approx-reciprocal sigmoid, f32 accumulation ->
    # slightly looser tolerance vs the pure-f32 reference.
    assert jnp.allclose(out, ref, atol=2e-3, rtol=2e-3), "mismatch vs reference"

    print("KERNEL_OK")
</pallas_src>

<mosaic_0001>
module attributes {stable_mosaic.version = 11 : i64} {
  func.func @glu_kernel(%arg0: i32, %arg1: memref<8x32xf32, #tpu.memory_space<vmem>>, %arg2: memref<32x32xbf16, #tpu.memory_space<vmem>>, %arg3: memref<1x32xf32, #tpu.memory_space<vmem>>, %arg4: memref<32x32xbf16, #tpu.memory_space<vmem>>, %arg5: memref<1x32xf32, #tpu.memory_space<vmem>>, %arg6: memref<32x32xbf16, #tpu.memory_space<vmem>>, %arg7: memref<1x32xf32, #tpu.memory_space<vmem>>, %arg8: memref<1x32xf32, #tpu.memory_space<vmem>>, %arg9: memref<1x32xf32, #tpu.memory_space<vmem>>, %arg10: memref<8x32xf32, #tpu.memory_space<vmem>>) attributes {dimension_semantics = [#tpu.dimension_semantics<parallel>], iteration_bounds = array<i64: 2>, scalar_prefetch = 0 : i64, scratch_operands = 0 : i64, tpu.core_type = #tpu.core_type<tc>, window_params = [{transform_indices = @transform_0, window_bounds = array<i64: 8, 32>}, {pipeline_mode = #tpu.pipeline_mode<synchronous>, transform_indices = @transform_1, window_bounds = array<i64: 32, 32>}, {pipeline_mode = #tpu.pipeline_mode<synchronous>, transform_indices = @transform_2, window_bounds = array<i64: 1, 32>}, {pipeline_mode = #tpu.pipeline_mode<synchronous>, transform_indices = @transform_3, window_bounds = array<i64: 32, 32>}, {pipeline_mode = #tpu.pipeline_mode<synchronous>, transform_indices = @transform_4, window_bounds = array<i64: 1, 32>}, {pipeline_mode = #tpu.pipeline_mode<synchronous>, transform_indices = @transform_5, window_bounds = array<i64: 32, 32>}, {pipeline_mode = #tpu.pipeline_mode<synchronous>, transform_indices = @transform_6, window_bounds = array<i64: 1, 32>}, {pipeline_mode = #tpu.pipeline_mode<synchronous>, transform_indices = @transform_7, window_bounds = array<i64: 1, 32>}, {pipeline_mode = #tpu.pipeline_mode<synchronous>, transform_indices = @transform_8, window_bounds = array<i64: 1, 32>}, {transform_indices = @transform_9, window_bounds = array<i64: 8, 32>}]} {
    %c0 = arith.constant 0 : index
    %c0_0 = arith.constant 0 : index
    %0 = vector.load %arg1[%c0, %c0_0] : memref<8x32xf32, #tpu.memory_space<vmem>>, vector<8x32xf32>
    %1 = arith.truncf %0 : vector<8x32xf32> to vector<8x32xbf16>
    %c0_1 = arith.constant 0 : index
    %c0_2 = arith.constant 0 : index
    %2 = vector.load %arg4[%c0_1, %c0_2] : memref<32x32xbf16, #tpu.memory_space<vmem>>, vector<32x32xbf16>
    %cst = arith.constant dense<0.000000e+00> : vector<8x32xf32>
    %3 = tpu.matmul %1, %2, %cst {dimension_numbers = #tpu.dot_dimension_numbers<[1], [0], [0], [1], [0, 0, 1, 1], [], []>} : vector<8x32xbf16>, vector<32x32xbf16>, vector<8x32xf32> -> vector<8x32xf32>
    %c0_3 = arith.constant 0 : index
    %c0_4 = arith.constant 0 : index
    %4 = vector.load %arg5[%c0_3, %c0_4] : memref<1x32xf32, #tpu.memory_space<vmem>>, vector<1x32xf32>
    %5 = vector.broadcast %4 : vector<1x32xf32> to vector<8x32xf32>
    %6 = arith.addf %3, %5 : vector<8x32xf32>
    %c0_5 = arith.constant 0 : index
    %c0_6 = arith.constant 0 : index
    %7 = vector.load %arg2[%c0_5, %c0_6] : memref<32x32xbf16, #tpu.memory_space<vmem>>, vector<32x32xbf16>
    %cst_7 = arith.constant dense<0.000000e+00> : vector<8x32xf32>
    %8 = tpu.matmul %1, %7, %cst_7 {dimension_numbers = #tpu.dot_dimension_numbers<[1], [0], [0], [1], [0, 0, 1, 1], [], []>} : vector<8x32xbf16>, vector<32x32xbf16>, vector<8x32xf32> -> vector<8x32xf32>
    %c0_8 = arith.constant 0 : index
    %c0_9 = arith.constant 0 : index
    %9 = vector.load %arg3[%c0_8, %c0_9] : memref<1x32xf32, #tpu.memory_space<vmem>>, vector<1x32xf32>
    %10 = vector.broadcast %9 : vector<1x32xf32> to vector<8x32xf32>
    %11 = arith.addf %8, %10 : vector<8x32xf32>
    %cst_10 = arith.constant 0.000000e+00 : f32
    %12 = vector.broadcast %cst_10 : f32 to vector<8x32xf32>
    %13 = arith.subf %12, %6 : vector<8x32xf32>
    %14 = math.exp %13 : vector<8x32xf32>
    %cst_11 = arith.constant 1.000000e+00 : f32
    %15 = vector.broadcast %cst_11 : f32 to vector<8x32xf32>
    %16 = arith.addf %15, %14 : vector<8x32xf32>
    %17 = tpu.reciprocal %16 {approx = true} : vector<8x32xf32> -> vector<8x32xf32>
    %18 = arith.mulf %11, %17 : vector<8x32xf32>
    %19 = arith.truncf %18 : vector<8x32xf32> to vector<8x32xbf16>
    %c0_12 = arith.constant 0 : index
    %c0_13 = arith.constant 0 : index
    %20 = vector.load %arg6[%c0_12, %c0_13] : memref<32x32xbf16, #tpu.memory_space<vmem>>, vector<32x32xbf16>
    %cst_14 = arith.constant dense<0.000000e+00> : vector<8x32xf32>
    %21 = tpu.matmul %19, %20, %cst_14 {dimension_numbers = #tpu.dot_dimension_numbers<[1], [0], [0], [1], [0, 0, 1, 1], [], []>} : vector<8x32xbf16>, vector<32x32xbf16>, vector<8x32xf32> -> vector<8x32xf32>
    %c0_15 = arith.constant 0 : index
    %c0_16 = arith.constant 0 : index
    %22 = vector.load %arg7[%c0_15, %c0_16] : memref<1x32xf32, #tpu.memory_space<vmem>>, vector<1x32xf32>
    %23 = vector.broadcast %22 : vector<1x32xf32> to vector<8x32xf32>
    %24 = arith.addf %21, %23 : vector<8x32xf32>
    %25 = arith.addf %24, %0 : vector<8x32xf32>
    %cst_17 = arith.constant dense<0.000000e+00> : vector<8xf32>
    %26 = vector.multi_reduction <add>, %25, %cst_17 [1] : vector<8x32xf32> to vector<8xf32>
    %27 = vector.shape_cast %26 : vector<8xf32> to vector<8x1xf32>
    %cst_18 = arith.constant 3.200000e+01 : f32
    %28 = vector.broadcast %cst_18 : f32 to vector<8x1xf32>
    %29 = arith.divf %27, %28 : vector<8x1xf32>
    %30 = vector.broadcast %29 : vector<8x1xf32> to vector<8x32xf32>
    %31 = arith.subf %25, %30 : vector<8x32xf32>
    %32 = arith.mulf %31, %31 : vector<8x32xf32>
    %cst_19 = arith.constant dense<0.000000e+00> : vector<8xf32>
    %33 = vector.multi_reduction <add>, %32, %cst_19 [1] : vector<8x32xf32> to vector<8xf32>
    %34 = vector.shape_cast %33 : vector<8xf32> to vector<8x1xf32>
    %cst_20 = arith.constant 3.200000e+01 : f32
    %35 = vector.broadcast %cst_20 : f32 to vector<8x1xf32>
    %36 = arith.divf %34, %35 : vector<8x1xf32>
    %cst_21 = arith.constant 9.99999996E-13 : f32
    %37 = vector.broadcast %cst_21 : f32 to vector<8x1xf32>
    %38 = arith.addf %36, %37 : vector<8x1xf32>
    %39 = math.rsqrt %38 : vector<8x1xf32>
    %40 = vector.broadcast %39 : vector<8x1xf32> to vector<8x32xf32>
    %41 = arith.mulf %31, %40 : vector<8x32xf32>
    %c0_22 = arith.constant 0 : index
    %c0_23 = arith.constant 0 : index
    %42 = vector.load %arg8[%c0_22, %c0_23] : memref<1x32xf32, #tpu.memory_space<vmem>>, vector<1x32xf32>
    %43 = vector.broadcast %42 : vector<1x32xf32> to vector<8x32xf32>
    %44 = arith.mulf %41, %43 : vector<8x32xf32>
    %c0_24 = arith.constant 0 : index
    %c0_25 = arith.constant 0 : index
    %45 = vector.load %arg9[%c0_24, %c0_25] : memref<1x32xf32, #tpu.memory_space<vmem>>, vector<1x32xf32>
    %46 = vector.broadcast %45 : vector<1x32xf32> to vector<8x32xf32>
    %47 = arith.addf %44, %46 : vector<8x32xf32>
    %c0_26 = arith.constant 0 : index
    %c0_27 = arith.constant 0 : index
    %48 = vector.load %arg10[%c0_26, %c0_27] : memref<8x32xf32, #tpu.memory_space<vmem>>, vector<8x32xf32>
    tpu.vector_store %arg10[%c0_26, %c0_27], %47 {strides = array<i32>} : memref<8x32xf32, #tpu.memory_space<vmem>>, vector<8x32xf32>,
    return
  }
  func.func @transform_0(%arg0: i32) -> (i32, i32) {
    %c0_i32 = arith.constant 0 : i32
    %c0_i32_0 = arith.constant 0 : i32
    return %arg0, %c0_i32 : i32, i32
  }
  func.func @transform_1(%arg0: i32) -> (i32, i32) {
    %c0_i32 = arith.constant 0 : i32
    %c0_i32_0 = arith.constant 0 : i32
    %c0_i32_1 = arith.constant 0 : i32
    return %c0_i32, %c0_i32_0 : i32, i32
  }
  func.func @transform_2(%arg0: i32) -> (i32, i32) {
    %c0_i32 = arith.constant 0 : i32
    %c0_i32_0 = arith.constant 0 : i32
    %c0_i32_1 = arith.constant 0 : i32
    return %c0_i32, %c0_i32_0 : i32, i32
  }
  func.func @transform_3(%arg0: i32) -> (i32, i32) {
    %c0_i32 = arith.constant 0 : i32
    %c0_i32_0 = arith.constant 0 : i32
    %c0_i32_1 = arith.constant 0 : i32
    return %c0_i32, %c0_i32_0 : i32, i32
  }
  func.func @transform_4(%arg0: i32) -> (i32, i32) {
    %c0_i32 = arith.constant 0 : i32
    %c0_i32_0 = arith.constant 0 : i32
    %c0_i32_1 = arith.constant 0 : i32
    return %c0_i32, %c0_i32_0 : i32, i32
  }
  func.func @transform_5(%arg0: i32) -> (i32, i32) {
    %c0_i32 = arith.constant 0 : i32
    %c0_i32_0 = arith.constant 0 : i32
    %c0_i32_1 = arith.constant 0 : i32
    return %c0_i32, %c0_i32_0 : i32, i32
  }
  func.func @transform_6(%arg0: i32) -> (i32, i32) {
    %c0_i32 = arith.constant 0 : i32
    %c0_i32_0 = arith.constant 0 : i32
    %c0_i32_1 = arith.constant 0 : i32
    return %c0_i32, %c0_i32_0 : i32, i32
  }
  func.func @transform_7(%arg0: i32) -> (i32, i32) {
    %c0_i32 = arith.constant 0 : i32
    %c0_i32_0 = arith.constant 0 : i32
    %c0_i32_1 = arith.constant 0 : i32
    return %c0_i32, %c0_i32_0 : i32, i32
  }
  func.func @transform_8(%arg0: i32) -> (i32, i32) {
    %c0_i32 = arith.constant 0 : i32
    %c0_i32_0 = arith.constant 0 : i32
    %c0_i32_1 = arith.constant 0 : i32
    return %c0_i32, %c0_i32_0 : i32, i32
  }
  func.func @transform_9(%arg0: i32) -> (i32, i32) {
    %c0_i32 = arith.constant 0 : i32
    %c0_i32_0 = arith.constant 0 : i32
    return %arg0, %c0_i32 : i32, i32
  }
}

</mosaic_0001>

<bundles_post_ra>
// kernel: glu_forward.1
= control target key start
LH: loop header
LB: loop body
LE: loop exit
PB: predicated region body
PF: predicated region fallthrough
CT: control target
= control target key end

     0   :  { %s1521_s0 = inlined_call_operand.hbm [shape: f32[16,32], index: 0, kind: input, shape index: {}]   ;;  %s1522_s1 = inlined_call_operand.vmem [shape: bf16[32,32], index: 1, kind: input, shape index: {}]   ;;  %s1523_s2 = inlined_call_operand.vmem [shape: f32[1,32], index: 2, kind: input, shape index: {}]   ;;  %s1524_s3 = inlined_call_operand.hbm [shape: bf16[32,32], index: 3, kind: input, shape index: {}]   ;;  %s1525_s4 = inlined_call_operand.vmem [shape: f32[1,32], index: 4, kind: input, shape index: {}]   ;;  %s1526_s5 = inlined_call_operand.vmem [shape: bf16[32,32], index: 5, kind: input, shape index: {}]   ;;  %s1527_s6 = inlined_call_operand.hbm [shape: f32[1,32], index: 6, kind: input, shape index: {}]   ;;  %s1528_s7 = inlined_call_operand.hbm [shape: f32[1,32], index: 7, kind: input, shape index: {}]   ;;  %s1529_s8 = inlined_call_operand.hbm [shape: f32[1,32], index: 8, kind: input, shape index: {}]   ;;  %s1530_s9 = inlined_call_operand.hbm [shape: f32[16,32], index: 9, kind: output, shape index: {}]  }
   0x1   :  { %1535 = sst [smem:[#allocation16_spill]] %s1524_s3 }
   0x2   :  { %1536 = sst [smem:[#allocation17_spill]] %s1530_s9 }
   0x3   :  { %14 = vsyncpa [#allocation3], 0 }
   0x4   :  { %16 = vsyncpa [#allocation3 + $0x1], 0 }
   0x5   :  { %17 = vsyncpa [#allocation6], 0 }
   0x6   :  { %18 = vsyncpa [#allocation9], 0 }
   0x7   :  { %19 = vsyncpa [#allocation4], 0 }
   0x8   :  { %21 = vsyncpa [#allocation4 + $0x1], 0  ;;  %s1208_s30 = smov 0   ;;  %s1210_s10 = smov 0  }
   0x9   :  { %s1212_s11 = smov 0   ;;  %s1214_s12 = smov 0  }
   0xa LB: > { %s1148_s13 = smov [#allocation5]   ;;  %s1229_s15 = sadd.s32 4294967295, %s1146_s12   ;;  %s1146_s12 = sphi %s1214_s12, %s1559_s12   ;;  %s1142_s11 = sphi %s1212_s11, %s1558_s11   ;;  %s1138_s10 = sphi %s1210_s10, %s1557_s10   ;;  %s1134_s30 = sphi %s1208_s30, %s1556_s30  }
   0xb   : > { %s270_s14 = sshll.u32 %s1148_s13, 4  ;;  %p761_p0 = scmp.ge.s32.totalorder %s1146_s12, 1  ;;  %s1234_s14 = int_to_ptr.vmem [resolvable:$true] %s270_s14 }
   0xc   : > { %p1532_p1 = scmp.eq.s32.totalorder %s1229_s15, 0  ;;  %p252_p2 = scmp.lt.s32.totalorder %s1146_s12, 3 }
   0xd   : > { %s1149_s17 = smov [#allocation8]   ;;  %s1150_s20 = smov [#allocation7]  }
   0xe   : > { %p1236_p3 = pnand %p761_p0, %p252_p2  ;;  %s301_s18 = sshll.u32 %s1149_s17, 4  ;;  %s1249_s18 = int_to_ptr.vmem [resolvable:$true] %s301_s18 }
   0xf   : > { %s290_s21 = sshll.u32 %s1150_s20, 4  ;;  %s1539_s3 = sld [smem:[#allocation16_spill]]  ;;  %s1251_s21 = int_to_ptr.vmem [resolvable:$true] %s290_s21 }
  0x10   : > { %s1537_s16 = scalar_select %p1236_p3, 1, 0 }
  0x11   : > { %p847_p5 = pneg %p1236_p3 }
  0x13   : > { %p1245_p6 = pnand %p847_p5, %p1532_p1 }
  0x15   : > { %s930_s24 = scalar_lea.hbm %s1539_s3, 256  ;;  %p1261_p8 = pneg %p1245_p6 }
  0x16   : > { %p931_p7 = scmp.ne.s32.totalorder %s1539_s3, %s930_s24  ;;  %p937_p11 = scmp.lt.u32.totalorder %s930_s24, %s1539_s3 }
  0x18   : > { %p933_p9 = pnand %p1261_p8, %p931_p7 }
  0x1a   : > { %p934_p10 = pneg %p933_p9 }
  0x1c   : > { %p939_p12 = pnand %p937_p11, %p934_p10 }
  0x1e   : > { %942 = shalt.err (!%p939_p12)
}
  0x1f   : > { %s943_s13 = scalar_lea.vmem %s1234_s14, 256  ;;  %p951_p5 = scmp.lt.s32.totalorder %s1234_s14, %s1234_s14 }
  0x20   : > { %p944_p13 = scmp.ne.s32.totalorder %s1234_s14, %s943_s13  ;;  %p952_p4 = scmp.lt.s32.totalorder %s943_s13, %s943_s13 }
  0x22   : > { %p946_p0 = pnand %p944_p13, %p1261_p8  ;;  %p953_p7 = por %p952_p4, %p951_p5 }
  0x24   : > { %p947_p2 = pneg %p946_p0 }
  0x26   : > { %p954_p9 = pnand %p953_p7, %p947_p2 }
  0x28   : > { %957 = shalt.err (!%p954_p9)
}
  0x29   : > { %s1151_s17 = smov 64   ;;  %s1152_s20 = smov 4  }
  0x2a   : > { %850 = dma.hbm_to_vmem [thread:$0]  (!%p1245_p6), %s1539_s3, 256, %s1234_s14, [#allocation6], %s1151_s17, %s1151_s17, %s1152_s20  }
  0x2b   : > { %s958_s26 = scalar_lea.hbm %s1528_s7, 16 }
  0x2c   : > { %p959_p4 = scmp.ne.s32.totalorder %s1528_s7, %s958_s26  ;;  %p965_p12 = scmp.lt.u32.totalorder %s958_s26, %s1528_s7 }
  0x2e   : > { %p961_p10 = pnand %p959_p4, %p1261_p8 }
  0x30   : > { %p962_p11 = pneg %p961_p10 }
  0x32   : > { %p967_p13 = pnand %p965_p12, %p962_p11 }
  0x34   : > { %970 = shalt.err (!%p967_p13)
}
  0x35   : > { %s971_s14 = scalar_lea.vmem %s1249_s18, 16  ;;  %s978_s17 = scalar_lea.vmem %s1249_s18, 32 }
  0x36   : > { %p972_p0 = scmp.ne.s32.totalorder %s1249_s18, %s971_s14  ;;  %p979_p7 = scmp.lt.s32.totalorder %s1249_s18, %s1249_s18 }
  0x37   : > { %p980_p9 = scmp.lt.s32.totalorder %s978_s17, %s971_s14 }
  0x38   : > { %p974_p2 = pnand %p972_p0, %p1261_p8 }
  0x39   : > { %p981_p4 = por %p980_p9, %p979_p7 }
  0x3a   : > { %p975_p5 = pneg %p974_p2 }
  0x3c   : > { %p982_p10 = pnand %p981_p4, %p975_p5 }
  0x3e   : > { %985 = shalt.err (!%p982_p10)
}
  0x3f   : > { %856 = dma.hbm_to_vmem [thread:$0]  (!%p1245_p6), %s1528_s7, 16, %s1249_s18, [#allocation9]  }
  0x40   : > { %s986_s24 = scalar_lea.hbm %s1527_s6, 16 }
  0x41   : > { %p987_p11 = scmp.ne.s32.totalorder %s1527_s6, %s986_s24  ;;  %p993_p0 = scmp.lt.u32.totalorder %s986_s24, %s1527_s6 }
  0x43   : > { %p989_p12 = pnand %p987_p11, %p1261_p8 }
  0x45   : > { %p990_p13 = pneg %p989_p12 }
  0x47   : > { %p995_p2 = pnand %p993_p0, %p990_p13 }
  0x49   : > { %998 = shalt.err (!%p995_p2)
}
  0x4a   : > { %s999_s18 = scalar_lea.vmem %s1251_s21, 16  ;;  %s1006_s13 = scalar_lea.vmem %s1251_s21, 32 }
  0x4b   : > { %p1000_p5 = scmp.ne.s32.totalorder %s1251_s21, %s999_s18  ;;  %p1007_p4 = scmp.lt.s32.totalorder %s1251_s21, %s1251_s21 }
  0x4c   : > { %p1008_p10 = scmp.lt.s32.totalorder %s1006_s13, %s999_s18 }
  0x4d   : > { %p1002_p7 = pnand %p1000_p5, %p1261_p8 }
  0x4e   : > { %p1009_p11 = por %p1008_p10, %p1007_p4 }
  0x4f   : > { %p1003_p9 = pneg %p1002_p7 }
  0x51   : > { %p1010_p12 = pnand %p1009_p11, %p1003_p9 }
  0x53   : > { %1013 = shalt.err (!%p1010_p12)
}
  0x54   : > { %853 = dma.hbm_to_vmem [thread:$0]  (!%p1245_p6), %s1527_s6, 16, %s1251_s21, [#allocation6]  }
  0x55   : > { %s1153_s9 = smov [#allocation10]   ;;  %s1014_s24 = scalar_lea.hbm %s1529_s8, 16 }
  0x56   : > { %s312_s20 = sshll.u32 %s1153_s9, 4  ;;  %p1015_p13 = scmp.ne.s32.totalorder %s1529_s8, %s1014_s24  ;;  %s313_s20 = int_to_ptr.vmem [resolvable:$true] %s312_s20 }
  0x57   : > { %p1021_p5 = scmp.lt.u32.totalorder %s1014_s24, %s1529_s8 }
  0x58   : > { %p1017_p0 = pnand %p1015_p13, %p1261_p8 }
  0x5a   : > { %p1018_p2 = pneg %p1017_p0 }
  0x5c   : > { %p1023_p7 = pnand %p1021_p5, %p1018_p2 }
  0x5e   : > { %1026 = shalt.err (!%p1023_p7)
}
  0x5f   : > { %s1027_s21 = scalar_lea.vmem %s313_s20, 16  ;;  %s1034_s18 = scalar_lea.vmem %s313_s20, 32 }
  0x60   : > { %p1028_p9 = scmp.ne.s32.totalorder %s313_s20, %s1027_s21  ;;  %p1035_p11 = scmp.lt.s32.totalorder %s313_s20, %s313_s20 }
  0x61   : > { %p1036_p12 = scmp.lt.s32.totalorder %s1034_s18, %s1027_s21 }
  0x62   : > { %p1030_p4 = pnand %p1028_p9, %p1261_p8 }
  0x63   : > { %p1037_p1 = por %p1036_p12, %p1035_p11 }
  0x64   : > { %p1031_p10 = pneg %p1030_p4 }
  0x66   : > { %p1038_p3 = pnand %p1037_p1, %p1031_p10 }
  0x68   : > { %1041 = shalt.err (!%p1038_p3)
}
  0x69   : > { %859 = dma.hbm_to_vmem [thread:$0]  (!%p1245_p6), %s1529_s8, 16, %s313_s20, [#allocation9]  }
  0x6a   : > { %s760_s27 = sadd.s32 4294967294, %s1146_s12   ;;  %s1350_s19 = sadd.s32 1, %s1146_s12  }
  0x6b   : > { %s31_s17 = ssub.s32 %s1146_s12, %s1350_s19  ;;  %s34_s9 = sadd.s32 1, %s1142_s11 }
  0x6c   : > { %p32_p1 = scmp.eq.s32.totalorder %s31_s17, 0  ;;  %p41_p3 = scmp.ne.s32.totalorder %s1142_s11, %s1138_s10 }
  0x6d   : > { %p42_p8 = scmp.eq.s32.totalorder %s1146_s12, 0  ;;  %p47_p13 = scmp.ne.s32.totalorder %s1138_s10, %s1134_s30 }
  0x6e   : > { %s1361_s22 = scalar_select %p32_p1, %s1142_s11, %s34_s9  }
  0x6f   : > { %p1363_p0 = por %p42_p8, %p41_p3  ;;  %p1542_p2 = scmp.eq.s32.totalorder %s1229_s15, 0 }
  0x70   : > { %p239_p5 = scmp.eq.s32.totalorder %s1229_s15, 1  ;;  %p245_p7 = scmp.eq.s32.totalorder %s760_s27, 1 }
  0x71   : > { %p1369_p6 = por %p1542_p2, %p47_p13  ;;  %p872_p9 = scmp.lt.s32.totalorder %s1146_s12, 2 }
  0x72   : > { %s323_s24 = sand.u32 1, %s1142_s11   ;;  %p1376_p4 = por %p239_p5, %p41_p3 }
  0x73   : > { %p1380_p10 = por %p245_p7, %p47_p13  ;;  %s767_s28 = sshll.u32 %s323_s24, 3 }
  0x74   : > { %s1544_s25 = scalar_select %p1376_p4, 1, 0 }
  0x75   : > { %s1545_s26 = scalar_select %p1380_p10, 1, 0 }
  0x76   : > { %s768_s29 = sshll.u32 %s1146_s12, 7  ;;  %s327_s14 = scalar_lea.vmem [#allocation2], %s767_s28 }
  0x77   : > { %s1388_s13 = scalar_lea.hbm %s1521_s0, %s768_s29  ;;  %s334_s27 = sshll.u32 %s327_s14, 4  ;;  %s1390_s27 = int_to_ptr.vmem [resolvable:$true] %s334_s27 }
  0x78   : > { %p1394_p11 = pnand %p872_p9, %p1363_p0  ;;  %s324_s9 = scalar_lea.sflag [#allocation3], %s323_s24 }
  0x79   : > { %s1042_s3 = scalar_lea.hbm %s1388_s13, 128  ;;  %s1047_s21 = scalar_lea.hbm %s1521_s0, 256 }
  0x7a   : > { %p1043_p12 = scmp.ne.s32.totalorder %s1388_s13, %s1042_s3  ;;  %p1044_p1 = pneg %p1394_p11 }
  0x7b   : > { %p1048_p13 = scmp.lt.u32.totalorder %s1388_s13, %s1521_s0  ;;  %p1049_p0 = scmp.lt.u32.totalorder %s1047_s21, %s1042_s3 }
  0x7c   : > { %p1045_p3 = pnand %p1044_p1, %p1043_p12  ;;  %p1051_p5 = scmp.lt.u32.totalorder %s1042_s3, %s1388_s13 }
  0x7d   : > { %p1050_p2 = por %p1049_p0, %p1048_p13 }
  0x7e   : > { %p1046_p8 = pneg %p1045_p3 }
  0x7f   : > { %p1052_p7 = por %p1051_p5, %p1050_p2 }
  0x81   : > { %p1053_p9 = pnand %p1052_p7, %p1046_p8 }
  0x83   : > { %1056 = shalt.err (!%p1053_p9)
}
  0x84   : > { %s1057_s24 = scalar_lea.vmem %s1390_s27, 128  ;;  %s1154_s14 = smov [#allocation2]  }
  0x85   : > { %p1058_p12 = scmp.ne.s32.totalorder %s1390_s27, %s1057_s24  ;;  %s1062_s28 = sshll.u32 %s1154_s14, 4  ;;  %s1063_s28 = int_to_ptr.vmem [resolvable:$false] %s1062_s28 }
  0x86   : > { %s1064_s29 = scalar_lea.vmem %s1063_s28, 256  ;;  %p1065_p4 = scmp.lt.s32.totalorder %s1390_s27, %s1063_s28 }
  0x87   : > { %p1060_p3 = pnand %p1058_p12, %p1044_p1  ;;  %p1066_p13 = scmp.lt.s32.totalorder %s1064_s29, %s1057_s24 }
  0x89   : > { %p1061_p10 = pneg %p1060_p3  ;;  %p1067_p0 = por %p1066_p13, %p1065_p4 }
  0x8b   : > { %p1068_p2 = pnand %p1067_p0, %p1061_p10 }
  0x8d   : > { %1071 = shalt.err (!%p1068_p2)
}
  0x8e   : > { %863 = dma.hbm_to_vmem [thread:$0]  (!%p1394_p11), %s1388_s13, 128, %s1390_s27, %s324_s9  }
  0x8f   : > { %p1547_p8 = scmp.ne.s32.totalorder %s1537_s16, 0 }
  0x90   : > { %s1426_s3 = sand.u32 (!%p1547_p8), 1, %s1138_s10  }
  0x91   : > { %343 = sbr.rel (%p1547_p8) target bundleno = 958 (0x3be), region = 56  ;;  %s770_s21 = sshll.u32 (!%p1547_p8), %s1426_s3, 3 }
  0x92   : > { %s346_s23 = scalar_lea.sflag (!%p1547_p8), [#allocation3], %s1426_s3  ;;  %s349_s18 = scalar_lea.vmem (!%p1547_p8), [#allocation2], %s770_s21 }
  0x98   : > { %1117 = dma.done.wait (%p1369_p6), %s346_s23, 128  }
  0x99   : > { %1119 = vsyncadd (%p1369_p6), %s346_s23, 4294967168  ;;  %p1548_p4 = scmp.eq.s32.totalorder %s1229_s15, 0 }
  0x9b   : > { %1121 = dma.done.wait (%p1548_p4), [#allocation6], 272   ;;  %p1549_p10 = pmov %p1548_p4 }
  0x9c   : > { %p1550_p11 = pmov %p1548_p4 }
  0x9d   : > { %1123 = vsyncadd (%p1549_p10), [#allocation6], 4294967024 }
  0x9e   : > { %1125 = dma.done.wait (%p1550_p11), [#allocation9], 32   ;;  %p1551_p1 = pmov %p1548_p4 }
  0x9f   : > { %v1155_v0 = vmov 0.0   ;;  %vm1156_vm0 = vmmov 0   ;;  %v918_v1 = vld [vmem:[#allocation5] sm:$0xff]   ;;  %v919_v2 = vld [vmem:[#allocation5 + $0x8] sm:$0xff]   ;;  %v401_v3 = vld [vmem:[%s349_s18] sm:$0xff]  ;;  %vm426_vm1 = vcmask 261120  }
  0xa0   : > { %1127 = vsyncadd (%p1551_p1), [#allocation9], 4294967264  ;;  %803 = vmatprep.subr.bf16.mxu0 %v1155_v0  ;;  %807 = vmatprep.mubr.msk.bf16.mxu0 %vm1156_vm0, %v1155_v0  ;;  %v920_v4 = vld [vmem:[%s1522_s1] sm:$0xff]   ;;  %v921_v5 = vld [vmem:[%s1522_s1 + $0x8] sm:$0xff]   ;;  %v402_v6 = vpack.c.bf16 %v401_v3, %v401_v3  ;;  %s791_s16 = sshll.u32 %s1229_s15, 7  ;;  %s399_s20 = scalar_lea.vmem [#allocation11], %s770_s21 }
  0xa1   : > { %811 = vmatprep.subr.bf16.mxu1 %v1155_v0  ;;  %815 = vmatprep.mubr.msk.bf16.mxu1 %vm1156_vm0, %v1155_v0  ;;  %v922_v7 = vld [vmem:[%s1526_s5] sm:$0xff]   ;;  %v923_v8 = vld [vmem:[%s1526_s5 + $0x8] sm:$0xff]   ;;  %s652_s13 = sshll.u32 %s399_s20, 4  ;;  %s1552_s9 = sld [smem:[#allocation17_spill]]  ;;  %s1478_s13 = int_to_ptr.vmem [resolvable:$true] %s652_s13 }
  0xa2   : > { %804 = vmatpush3.bf16.msra.mxu0 %v918_v1  ;;  %812 = vmatpush3.bf16.msra.mxu1 %v920_v4  ;;  %v776_v9 = vld [vmem:[%s1525_s4] ss:$0 sm:$0xff]  ;;  %v788_v45 = vld [vmem:[#allocation8] ss:$0 sm:$0xff]  ;;  %v789_v47 = vld [vmem:[#allocation10] ss:$0 sm:$0xff] }
  0xa3   : > { %805 = vmatprep.subr.bf16.mxu0 %v1155_v0  ;;  %813 = vmatprep.subr.bf16.mxu1 %v1155_v0  ;;  %v780_v23 = vld [vmem:[%s1523_s2] ss:$0 sm:$0xff]  ;;  %s639_s14 = scalar_lea.sflag [#allocation4], %s1426_s3  ;;  %s1072_s28 = scalar_lea.vmem %s1478_s13, 128 }
  0xa4   : > { %v784_v28 = vld [vmem:[#allocation7] ss:$0 sm:$0xff]  ;;  %p1073_p6 = scmp.ne.s32.totalorder %s1478_s13, %s1072_s28  ;;  %p1553_p5 = scmp.ne.s32.totalorder %s1544_s25, 0 }
  0xa5   : > { %s1157_s15 = smov [#allocation11]  }
  0xa6   : > { %806 = vmatpush3.bf16.msra.mxu0 %v919_v2  ;;  %814 = vmatpush3.bf16.msra.mxu1 %v921_v5  ;;  %p1074_p7 = pnand %p1073_p6, %p1553_p5  ;;  %s1076_s21 = sshll.u32 %s1157_s15, 4  ;;  %s1077_s21 = int_to_ptr.vmem [resolvable:$false] %s1076_s21 }
  0xa7   : > { %819 = vmatprep.subr.bf16.mxu0 %v1155_v0  ;;  %s1476_s24 = scalar_lea.hbm %s1552_s9, %s791_s16  ;;  %s1078_s29 = scalar_lea.vmem %s1077_s21, 256 }
  0xa8   : > { %p1075_p9 = pneg %p1074_p7  ;;  %p1079_p12 = scmp.lt.s32.totalorder %s1478_s13, %s1077_s21 }
  0xa9   : > { %808 = vmatmul.mubr.msk.bf16.vlgmr.msra.gmra.mrb[0].mxu0 %vm426_vm1, %v402_v6  ;;  %816 = vmatmul.mubr.msk.bf16.vlgmr.msra.gmra.mrb[0].mxu1 %vm426_vm1, %v402_v6  ;;  %p1080_p3 = scmp.lt.s32.totalorder %s1078_s29, %s1072_s28 }
  0xaa   : > { %823 = vmatprep.mubr.msk.bf16.mxu0 %vm1156_vm0, %v1155_v0  ;;  %820 = vmatpush3.bf16.msra.mxu0 %v922_v7 }
  0xab   : > { %821 = vmatprep.subr.bf16.mxu0 %v1155_v0  ;;  %p1081_p13 = por %p1080_p3, %p1079_p12 }
  0xad   : > { %p1082_p0 = pnand %p1081_p13, %p1075_p9 }
  0xae   : > { %822 = vmatpush3.bf16.msra.mxu0 %v923_v8 }
 0x17c   : > { %v464_v10 = vpop.f32.mrb[0].mxu0  ;;  %v527_v16 = vpop.f32.mrb[0].mxu1 }
 0x17d   : > { %v465_v11 = vadd.f32 %v776_v9, %v464_v10  ;;  %v809_v12 = vpop.f32.mrb[1].mxu0  ;;  %v817_v17 = vpop.f32.mrb[1].mxu1  ;;  %v528_v24 = vadd.f32 %v780_v23, %v527_v16 }
 0x17e   : > { %v467_v13 = vpop.f32.mrb[2].mxu0  ;;  %v530_v19 = vpop.f32.mrb[2].mxu1 }
 0x17f   : > { %v533_v14 = vsub.f32 0.0, %v465_v11  ;;  %v810_v15 = vpop.f32.mrb[3].mxu0  ;;  %v818_v20 = vpop.f32.mrb[3].mxu1 }
 0x181   : > { %v534_v18 = vmul.f32 1.442695, %v533_v14 }
 0x183   : > { %924 = vpow2.f32 %v534_v18 }
 0x18d   : > { %v925_v21 = vpop.eup %924 }
 0x18e   : > { %v536_v22 = vadd.f32 1.0, %v925_v21 }
 0x190   : > { %926 = vrcp.f32 %v536_v22 }
 0x19a   : > { %v927_v25 = vpop.eup %926 }
 0x19b   : > { %v538_v26 = vmul.f32 %v927_v25, %v528_v24 }
 0x19d   : > { %v539_v27 = vpack.c.bf16 %v538_v26, %v538_v26 }
 0x19f   : > { %824 = vmatmul.mubr.msk.bf16.vlgmr.msra.gmra.mrb[4].mxu0 %vm426_vm1, %v539_v27 }
 0x272   : > { %v600_v29 = vpop.f32.mrb[4].mxu0 }
 0x273   : > { %v601_v30 = vadd.f32 %v784_v28, %v600_v29  ;;  %v825_v31 = vpop.f32.mrb[5].mxu0 }
 0x274   : > { %v603_v32 = vpop.f32.mrb[6].mxu0 }
 0x275   : > { %v826_v33 = vpop.f32.mrb[7].mxu0  ;;  %v606_v34 = vadd.f32 %v601_v30, %v401_v3 }
 0x277   : > { %v607_v35 = vsel %vm426_vm1, %v606_v34, 0.0 }
 0x278   : > { %608 = vadd.xlane.f32.xlu0 %v607_v35 }
 0x305   : > { %v609_v36 = vpop.xlane.xlu0 %608 }
 0x306   : > { %v611_v37 = vmul.f32 0.03125, %v609_v36 }
 0x308   : > { %v612_v38 = vsub.f32 %v606_v34, %v611_v37 }
 0x30a   : > { %v613_v39 = vmul.f32 %v612_v38, %v612_v38 }
 0x30c   : > { %v614_v40 = vsel %vm426_vm1, %v613_v39, 0.0 }
 0x30d   : > { %615 = vadd.xlane.f32.xlu0 %v614_v40 }
 0x39a   : > { %v616_v41 = vpop.xlane.xlu0 %615 }
 0x39b   : > { %v617_v42 = vmul.f32 0.03125, %v616_v41 }
 0x39d   : > { %v618_v43 = vadd.f32 1e-12, %v617_v42 }
 0x39f   : > { %928 = vrsqrt.f32 %v618_v43 }
 0x3a9   : > { %v929_v44 = vpop.eup %928 }
 0x3aa   : > { %v620_v46 = vmul.f32 %v929_v44, %v612_v38 }
 0x3ac   : > { %v628_v48 = vmul.f32 %v788_v45, %v620_v46 }
 0x3ae   : > { %v636_v49 = vadd.f32 %v789_v47, %v628_v48 }
 0x3b0   : > { %637 = vst.msk [vmem:[%s399_s20] sm:$0xff] %vm426_vm1, %v636_v49 }
 0x3b1   : > { %1085 = shalt.err (!%p1082_p0)
}
 0x3b2   : > { %s1086_s3 = scalar_lea.hbm %s1476_s24, 128  ;;  %s1090_s16 = scalar_lea.hbm %s1552_s9, 256 }
 0x3b3   : > { %p1087_p2 = scmp.ne.s32.totalorder %s1476_s24, %s1086_s3  ;;  %p1091_p10 = scmp.lt.u32.totalorder %s1476_s24, %s1552_s9 }
 0x3b4   : > { %p1092_p11 = scmp.lt.u32.totalorder %s1090_s16, %s1086_s3  ;;  %p1094_p6 = scmp.lt.u32.totalorder %s1086_s3, %s1476_s24 }
 0x3b5   : > { %p1088_p8 = pnand %p1087_p2, %p1553_p5 }
 0x3b6   : > { %p1093_p1 = por %p1092_p11, %p1091_p10 }
 0x3b7   : > { %p1089_p4 = pneg %p1088_p8 }
 0x3b8   : > { %p1095_p7 = por %p1094_p6, %p1093_p1 }
 0x3ba   : > { %p1096_p9 = pnand %p1095_p7, %p1089_p4 }
 0x3bc   : > { %1099 = shalt.err (!%p1096_p9)
}
 0x3bd   : > { %845 = dma.vmem_to_hbm [thread:$0]  (%p1553_p5), %s1478_s13, 128, %s1476_s24, %s639_s14  }
 0x3be PF: > { %s664_s17 = sand.u32 1, %s1134_s30   ;;  %p1554_p12 = scmp.ne.s32.totalorder %s1545_s26, 0 }
 0x3bf   : > { %p1555_p3 = scmp.ge.s32.totalorder %s1146_s12, 2  ;;  %s665_s28 = scalar_lea.sflag [#allocation4], %s664_s17 }
 0x3c1   : > { %p865_p13 = pnand %p1555_p3, %p1554_p12 }
 0x3c3   : > { %1129 = dma.done.wait (!%p865_p13), %s665_s28, 128  }
 0x3c4   : > { %1131 = vsyncadd (!%p865_p13), %s665_s28, 4294967168  ;;  %p24_p0 = scmp.ge.s32.totalorder %s1350_s19, 4   ;;  %s1556_s30 = smov %s1138_s10 }
 0x3c5   : > { %s1557_s10 = smov %s1142_s11  ;;  %s1558_s11 = smov %s1361_s22 }
 0x3c6   : > { %s1559_s12 = smov %s1350_s19  ;;  %26 = sbr.rel (!%p24_p0) target bundleno = 10 (0xa), region = 117 }
 0x3cd   :  { %670 = vsyncpa [#allocation3], 1 }
 0x3ce   :  { %672 = vsyncpa [#allocation3 + $0x1], 1 }
 0x3cf   :  { %673 = vsyncpa [#allocation6], 1 }
 0x3d0   :  { %674 = vsyncpa [#allocation9], 1 }
 0x3d1   :  { %675 = vsyncpa [#allocation4], 1 }
 0x3d2   :  { %677 = vsyncpa [#allocation4 + $0x1], 1 }

</bundles_post_ra>
